<compile_context>
chip_gen: v7x
topology: tpu7x:2x2x1
jax: 0.10.0
libtpu: 0.0.40
codegen_flags: <defaults>
</compile_context>

<pallas_src>
import math
import functools

import jax
import jax.numpy as jnp
from jax import lax
from jax.experimental import pallas as pl
from jax.experimental.pallas import tpu as pltpu


def _round_up(x: int, m: int) -> int:
    return ((x + m - 1) // m) * m


# ----------------------------------------------------------------------------
# EqualLinear: tiled MXU matmul with f32 accumulator.
# ----------------------------------------------------------------------------
def _equal_linear_kernel(x_ref, w_ref, b_ref, o_ref, acc_ref, *, scale):
    # x_ref: (tm, tk)   w_ref: (tn, tk)   b_ref: (1, tn)
    # o_ref: (tm, tn)   acc_ref: (tm, tn) f32 scratch (persists across k)
    k = pl.program_id(2)

    @pl.when(k == 0)
    def _():
        acc_ref[...] = jnp.zeros_like(acc_ref)

    # Contract x[tm, tk] with w[tn, tk] over the K axis (== x @ w.T) so the
    # weight never needs an HBM-side transpose; MXU handles the trans-RHS.
    acc_ref[...] += lax.dot_general(
        x_ref[...],
        w_ref[...],
        dimension_numbers=(((1,), (1,)), ((), ())),
        preferred_element_type=jnp.float32,
    )

    @pl.when(k == pl.num_programs(2) - 1)
    def _():
        # Equal-lr scale + bias as a one-time epilogue (VPU work off the
        # per-k critical path). Keep the scale in-kernel (rides spare VPU slot).
        o_ref[...] = (acc_ref[...] * scale + b_ref[...]).astype(o_ref.dtype)


def equal_linear(x, weight_orig, bias, *, tm_max=256, tn_max=256, tk_max=512):
    """x: [M, in_dim], weight_orig: [out_dim, in_dim], bias: [out_dim]."""
    M, K = x.shape
    N, K2 = weight_orig.shape
    assert K == K2
    fan_in = K  # nn.Linear: weight.size(1) * weight[0][0].numel() == in_dim
    scale = math.sqrt(2.0 / fan_in)

    # Tile sizes: (8,128)-aligned, capped so tiles + double buffers fit the
    # smallest VMEM (v7x: 64 MiB physical / 32 MiB scoped default).
    tm = min(tm_max, _round_up(M, 8))
    tn = min(tn_max, _round_up(N, 128))
    tk = min(tk_max, _round_up(K, 128))
    Mp, Np, Kp = _round_up(M, tm), _round_up(N, tn), _round_up(K, tk)

    # Zero-padding is numerically inert: extra K terms contribute 0 to the
    # accumulation; extra M/N rows/cols are sliced off below.
    x_p = x if (Mp == M and Kp == K) else jnp.pad(x, ((0, Mp - M), (0, Kp - K)))
    w_p = (weight_orig if (Np == N and Kp == K)
           else jnp.pad(weight_orig, ((0, Np - N), (0, Kp - K))))
    b_p = (bias if Np == N else jnp.pad(bias, (0, Np - N))).reshape(1, Np)

    grid = (Mp // tm, Np // tn, Kp // tk)
    kernel = functools.partial(_equal_linear_kernel, scale=scale)

    out = pl.pallas_call(
        kernel,
        out_shape=jax.ShapeDtypeStruct((Mp, Np), x.dtype),
        grid_spec=pltpu.PrefetchScalarGridSpec(
            num_scalar_prefetch=0,
            grid=grid,
            in_specs=[
                pl.BlockSpec((tm, tk), lambda i, j, k: (i, k)),   # x
                pl.BlockSpec((tn, tk), lambda i, j, k: (j, k)),   # weight [N, K]
                pl.BlockSpec((1, tn), lambda i, j, k: (0, j)),    # bias
            ],
            out_specs=pl.BlockSpec((tm, tn), lambda i, j, k: (i, j)),
            scratch_shapes=[pltpu.VMEM((tm, tn), jnp.float32)],
        ),
        compiler_params=pltpu.CompilerParams(
            dimension_semantics=("parallel", "parallel", "arbitrary"),
            vmem_limit_bytes=48 * 1024 * 1024,
        ),
    )(x_p, w_p, b_p)

    if (Mp, Np) != (M, N):
        out = out[:M, :N]
    return out


# ----------------------------------------------------------------------------
# PixelNorm: row-wise normalization over the feature axis.
# ----------------------------------------------------------------------------
def _pixel_norm_kernel(x_ref, o_ref):
    x = x_ref[...].astype(jnp.float32)
    ms = jnp.mean(x * x, axis=1, keepdims=True)
    o_ref[...] = (x * lax.rsqrt(ms + 1e-8)).astype(o_ref.dtype)


def pixel_norm(x, *, tm_max=256):
    M, D = x.shape
    tm = min(tm_max, _round_up(M, 8))
    Mp = _round_up(M, tm)
    # Only pad rows; padding D would change the mean denominator.
    x_p = x if Mp == M else jnp.pad(x, ((0, Mp - M), (0, 0)))

    out = pl.pallas_call(
        _pixel_norm_kernel,
        out_shape=jax.ShapeDtypeStruct((Mp, D), x.dtype),
        grid_spec=pltpu.PrefetchScalarGridSpec(
            num_scalar_prefetch=0,
            grid=(Mp // tm,),
            in_specs=[pl.BlockSpec((tm, D), lambda i: (i, 0))],
            out_specs=pl.BlockSpec((tm, D), lambda i: (i, 0)),
        ),
        compiler_params=pltpu.CompilerParams(
            dimension_semantics=("parallel",)),
    )(x_p)

    return out[:M] if Mp != M else out


# ----------------------------------------------------------------------------
# OldGenerator style-mapping trunk: PixelNorm -> n_mlp x EqualLinear.
# ----------------------------------------------------------------------------
def style_mapping(styles, weights, biases):
    out = pixel_norm(styles)
    for w, b in zip(weights, biases):
        out = equal_linear(out, w, b)
    return out


if __name__ == "__main__":
    key = jax.random.PRNGKey(0)

    # --- small shapes consistent with OldGenerator's style MLP -------------
    batch, style_dim, n_mlp = 2, 32, 8
    keys = jax.random.split(key, n_mlp + 3)

    styles = jax.random.normal(keys[0], (batch, style_dim), dtype=jnp.float32)
    # EqualLinear init: weight_orig.normal_(), bias zeroed.
    weights = [jax.random.normal(keys[i + 1], (style_dim, style_dim), jnp.float32)
               for i in range(n_mlp)]
    biases = [jnp.zeros((style_dim,), jnp.float32) for _ in range(n_mlp)]

    out = style_mapping(styles, weights, biases)
    out = jax.block_until_ready(out)

    # Pure-JAX reference (PyTorch semantics).
    ref = styles / jnp.sqrt(jnp.mean(styles ** 2, axis=1, keepdims=True) + 1e-8)
    s = math.sqrt(2.0 / style_dim)
    for w, b in zip(weights, biases):
        ref = ref @ (w * s).T + b

    assert out.shape == (batch, style_dim)
    assert jnp.allclose(out, ref, atol=1e-3, rtol=1e-3), \
        float(jnp.max(jnp.abs(out - ref)))

    # --- larger shape to exercise the multi-tile / K-reduction path --------
    M2, K2, N2 = 200, 1024, 320   # deliberately non-aligned (padding path)
    xb = jax.random.normal(keys[-2], (M2, K2), dtype=jnp.float32)
    wb = jax.random.normal(keys[-1], (N2, K2), dtype=jnp.float32)
    bb = jnp.zeros((N2,), dtype=jnp.float32)

    out2 = jax.block_until_ready(equal_linear(xb, wb, bb))
    s2 = math.sqrt(2.0 / K2)
    ref2 = xb @ (wb * s2).T + bb
    assert out2.shape == (M2, N2)
    assert jnp.allclose(out2, ref2, atol=2e-3, rtol=2e-3), \
        float(jnp.max(jnp.abs(out2 - ref2)))

    print("KERNEL_OK")
</pallas_src>

<mosaic_0001>
module attributes {stable_mosaic.version = 11 : i64} {
  func.func @_pixel_norm_kernel(%arg0: i32, %arg1: memref<8x32xf32, #tpu.memory_space<vmem>>, %arg2: memref<8x32xf32, #tpu.memory_space<vmem>>) attributes {dimension_semantics = [#tpu.dimension_semantics<parallel>], iteration_bounds = array<i64: 1>, scalar_prefetch = 0 : i64, scratch_operands = 0 : i64, tpu.core_type = #tpu.core_type<tc>, window_params = [{transform_indices = @transform_0, window_bounds = array<i64: 8, 32>}, {transform_indices = @transform_1, window_bounds = array<i64: 8, 32>}]} {
    %c0 = arith.constant 0 : index
    %c0_0 = arith.constant 0 : index
    %0 = vector.load %arg1[%c0, %c0_0] : memref<8x32xf32, #tpu.memory_space<vmem>>, vector<8x32xf32>
    %1 = arith.mulf %0, %0 : vector<8x32xf32>
    %cst = arith.constant dense<0.000000e+00> : vector<8xf32>
    %2 = vector.multi_reduction <add>, %1, %cst [1] : vector<8x32xf32> to vector<8xf32>
    %3 = vector.shape_cast %2 : vector<8xf32> to vector<8x1xf32>
    %cst_1 = arith.constant 3.200000e+01 : f32
    %4 = vector.broadcast %cst_1 : f32 to vector<8x1xf32>
    %5 = arith.divf %3, %4 : vector<8x1xf32>
    %cst_2 = arith.constant 9.99999993E-9 : f32
    %6 = vector.broadcast %cst_2 : f32 to vector<8x1xf32>
    %7 = arith.addf %5, %6 : vector<8x1xf32>
    %8 = math.rsqrt %7 : vector<8x1xf32>
    %9 = vector.broadcast %8 : vector<8x1xf32> to vector<8x32xf32>
    %10 = arith.mulf %0, %9 : vector<8x32xf32>
    %c0_3 = arith.constant 0 : index
    %c0_4 = arith.constant 0 : index
    %11 = vector.load %arg2[%c0_3, %c0_4] : memref<8x32xf32, #tpu.memory_space<vmem>>, vector<8x32xf32>
    tpu.vector_store %arg2[%c0_3, %c0_4], %10 {strides = array<i32>} : memref<8x32xf32, #tpu.memory_space<vmem>>, vector<8x32xf32>,
    return
  }
  func.func @transform_0(%arg0: i32) -> (i32, i32) {
    %c0_i32 = arith.constant 0 : i32
    %c0_i32_0 = arith.constant 0 : i32
    return %arg0, %c0_i32 : i32, i32
  }
  func.func @transform_1(%arg0: i32) -> (i32, i32) {
    %c0_i32 = arith.constant 0 : i32
    %c0_i32_0 = arith.constant 0 : i32
    return %arg0, %c0_i32 : i32, i32
  }
}

</mosaic_0001>

<bundles_post_ra>
// kernel: tpu_custom_call.1
= control target key start
LH: loop header
LB: loop body
LE: loop exit
PB: predicated region body
PF: predicated region fallthrough
CT: control target
= control target key end

     0   :  { %6 = vsyncpa [#allocation3], 0  ;;  %s136_s0 = inlined_call_operand.hbm [shape: f32[8,32], index: 0, kind: input, shape index: {}]   ;;  %s137_s1 = inlined_call_operand.hbm [shape: f32[8,32], index: 1, kind: output, shape index: {}]  }
   0x1   :  { %7 = vsyncpa [#allocation4], 0  ;;  %s100_s6 = smov [#allocation2]   ;;  %s52_s10 = scalar_lea.hbm %s136_s0, 128 }
   0x2   :  { %s14_s7 = sshll.u32 %s100_s6, 4  ;;  %p53_p0 = scmp.ne.s32.totalorder %s136_s0, %s52_s10  ;;  %s15_s7 = int_to_ptr.vmem [resolvable:$true] %s14_s7 }
   0x3   :  { %p56_p1 = scmp.lt.u32.totalorder %s52_s10, %s136_s0 }
   0x5   :  { %p58_p2 = pnand %p56_p1, %p53_p0 }
   0x7   :  { %61 = shalt.err (!%p58_p2)
}
   0x8   :  { %s62_s15 = scalar_lea.vmem %s15_s7, 128  ;;  %p67_p4 = scmp.lt.s32.totalorder %s15_s7, %s15_s7 }
   0x9   :  { %p63_p3 = scmp.ne.s32.totalorder %s15_s7, %s62_s15  ;;  %p68_p5 = scmp.lt.s32.totalorder %s62_s15, %s62_s15 }
   0xb   :  { %p69_p6 = por %p68_p5, %p67_p4 }
   0xd   :  { %p70_p7 = pnand %p69_p6, %p63_p3 }
   0xf   :  { %73 = shalt.err (!%p70_p7)
}
  0x10   :  { %17 = dma.hbm_to_vmem [thread:$0]  %s136_s0, 128, %s15_s7, [#allocation3]  }
  0x11   :  { %96 = dma.done.wait [#allocation3], 128  }
  0x12   :  { %97 = vsyncadd [#allocation3], 4294967168  ;;  %v21_v0 = vld [vmem:[#allocation2] sm:$0xff]  ;;  %vm23_vm0 = vcmask 261120   ;;  %s101_s18 = smov [#allocation5]  }
  0x13   :  { %v22_v1 = vmul.f32 %v21_v0, %v21_v0  ;;  %s39_s19 = sshll.u32 %s101_s18, 4  ;;  %s40_s19 = int_to_ptr.vmem [resolvable:$true] %s39_s19 }
  0x14   :  { %s74_s20 = scalar_lea.vmem %s40_s19, 128  ;;  %p79_p9 = scmp.lt.s32.totalorder %s40_s19, %s40_s19 }
  0x15   :  { %v24_v2 = vsel %vm23_vm0, %v22_v1, 0.0  ;;  %p75_p8 = scmp.ne.s32.totalorder %s40_s19, %s74_s20  ;;  %p80_p10 = scmp.lt.s32.totalorder %s74_s20, %s74_s20 }
  0x16   :  { %25 = vadd.xlane.f32.xlu0 %v24_v2 }
  0x17   :  { %p81_p11 = por %p80_p10, %p79_p9 }
  0x19   :  { %p82_p12 = pnand %p81_p11, %p75_p8 }
  0xa3   :  { %v26_v3 = vpop.xlane.xlu0 %25 }
  0xa4   :  { %v28_v4 = vmul.f32 0.03125, %v26_v3 }
  0xa6   :  { %v29_v5 = vadd.f32 1e-08, %v28_v4 }
  0xa8   :  { %50 = vrsqrt.f32 %v29_v5 }
  0xb2   :  { %v51_v6 = vpop.eup %50 }
  0xb3   :  { %v31_v7 = vmul.f32 %v51_v6, %v21_v0 }
  0xb5   :  { %32 = vst.msk [vmem:[#allocation5] sm:$0xff] %vm23_vm0, %v31_v7 }
  0xb6   :  { %85 = shalt.err (!%p82_p12)
}
  0xb7   :  { %s86_s22 = scalar_lea.hbm %s137_s1, 128 }
  0xb8   :  { %p87_p13 = scmp.ne.s32.totalorder %s137_s1, %s86_s22  ;;  %p90_p0 = scmp.lt.u32.totalorder %s86_s22, %s137_s1 }
  0xba   :  { %p92_p1 = pnand %p90_p0, %p87_p13 }
  0xbc   :  { %95 = shalt.err (!%p92_p1)
}
  0xbd   :  { %42 = dma.vmem_to_hbm [thread:$0]  %s40_s19, 128, %s137_s1, [#allocation4]  }
  0xbe   :  { %98 = dma.done.wait [#allocation4], 128  }
  0xbf   :  { %99 = vsyncadd [#allocation4], 4294967168 }
  0xc0   :  { %46 = vsyncpa [#allocation3], 1 }
  0xc1   :  { %47 = vsyncpa [#allocation4], 1 }

</bundles_post_ra>
